<compile_context>
chip_gen: v7x
topology: tpu7x:2x2x1
jax: 0.10.0
libtpu: 0.0.40
codegen_flags: <defaults>
</compile_context>

<pallas_src>
import jax
import jax.numpy as jnp
from jax.experimental import pallas as pl
from jax.experimental.pallas import tpu as pltpu


def _round_down_128(x: int) -> int:
    return (x // 128) * 128


def _make_full_row_kernel(normalize_embeddings: bool):
    """Full rows resident: one fused multiply + lane-reduce per (TB, D) block."""
    def kernel(emb_ref, norms_ref):
        x = emb_ref[...].astype(jnp.float32)               # (TB, D)
        norm = jnp.sqrt(jnp.sum(x * x, axis=1))            # (TB,)
        if normalize_embeddings:
            # ||x / max(||x||, eps)|| == ||x|| / max(||x||, eps)  (torch eps=1e-12)
            norm = norm / jnp.maximum(norm, 1e-12)
        norms_ref[...] = norm.reshape(1, -1)                # lane-dense (1, TB) store
    return kernel


def _make_d_tiled_kernel(normalize_embeddings: bool, D: int, TD: int):
    """K-style accumulation over D tiles with a (1, TB) f32 scratch accumulator."""
    needs_mask = (D % TD) != 0

    def kernel(emb_ref, norms_ref, acc_ref):
        d = pl.program_id(1)

        @pl.when(d == 0)
        def _():
            acc_ref[...] = jnp.zeros_like(acc_ref)

        x = emb_ref[...].astype(jnp.float32)                # (TB, TD)
        if needs_mask:
            # Zero out-of-range columns of the (possibly partial) last D block.
            col = d * TD + jax.lax.broadcasted_iota(jnp.int32, x.shape, 1)
            x = jnp.where(col < D, x, 0.0)
        acc_ref[...] += jnp.sum(x * x, axis=1).reshape(1, -1)

        @pl.when(d == pl.num_programs(1) - 1)
        def _():
            norm = jnp.sqrt(acc_ref[...])
            if normalize_embeddings:
                norm = norm / jnp.maximum(norm, 1e-12)
            norms_ref[...] = norm
    return kernel


def _row_norms_pallas(embeddings, normalize_embeddings: bool, *,
                      tile_budget_bytes: int = 2 * 1024 * 1024,
                      small_bytes: int = 2 * 1024 * 1024):
    """Per-row L2 norms (after optional L2 normalization), via one Pallas kernel."""
    B, D = embeddings.shape
    itemsize = embeddings.dtype.itemsize
    bytes_per_row = D * itemsize
    total_bytes = B * bytes_per_row

    cost = pl.CostEstimate(flops=2 * B * D, transcendentals=0,
                           bytes_accessed=total_bytes + B * 4)

    # Can a >=128-row block of full-D rows fit the per-tile budget?
    full_rows_fit = bytes_per_row * min(B, 128) <= tile_budget_bytes

    if total_bytes <= small_bytes or (B < 256 and full_rows_fit):
        # Single full-array block (<= ~4 MiB per buffer by construction).
        norms = pl.pallas_call(
            _make_full_row_kernel(normalize_embeddings),
            grid=(1,),
            in_specs=[pl.BlockSpec((B, D), lambda i: (0, 0))],
            out_specs=pl.BlockSpec((1, B), lambda i: (0, 0)),
            out_shape=jax.ShapeDtypeStruct((1, B), jnp.float32),
            compiler_params=pltpu.CompilerParams(
                dimension_semantics=("arbitrary",)),
            cost_estimate=cost,
        )(embeddings)
        return norms[0, :B]

    if full_rows_fit:
        # B >= 256 here: tile over batch, full-D rows per block.  No input
        # padding: the last block may be partial, its junk rows are discarded
        # by the [:B] slice below.  TB sized from the byte budget, capped so
        # there are always >= 2 grid steps (v7x megacore).
        TB = _round_down_128(tile_budget_bytes // bytes_per_row)
        TB = max(128, min(TB, _round_down_128(B - 1)))
        num_tiles = pl.cdiv(B, TB)
        norms = pl.pallas_call(
            _make_full_row_kernel(normalize_embeddings),
            grid=(num_tiles,),
            in_specs=[pl.BlockSpec((TB, D), lambda i: (i, 0))],
            out_specs=pl.BlockSpec((1, TB), lambda i: (0, i)),
            out_shape=jax.ShapeDtypeStruct((1, num_tiles * TB), jnp.float32),
            compiler_params=pltpu.CompilerParams(
                dimension_semantics=("parallel",)),
            cost_estimate=cost,
        )(embeddings)
        return norms[0, :B]

    # D-tiled accumulation path for very large embedding dims.
    TB = B if B <= 512 else 512
    TD = max(128, _round_down_128(tile_budget_bytes // (TB * itemsize)))
    if TD >= D:
        TD = D
    num_b = pl.cdiv(B, TB)
    num_d = pl.cdiv(D, TD)
    norms = pl.pallas_call(
        _make_d_tiled_kernel(normalize_embeddings, D, TD),
        grid=(num_b, num_d),
        in_specs=[pl.BlockSpec((TB, TD), lambda i, d: (i, d))],
        out_specs=pl.BlockSpec((1, TB), lambda i, d: (0, i)),
        out_shape=jax.ShapeDtypeStruct((1, num_b * TB), jnp.float32),
        scratch_shapes=[pltpu.VMEM((1, TB), jnp.float32)],
        compiler_params=pltpu.CompilerParams(
            dimension_semantics=("parallel", "arbitrary")),
        cost_estimate=cost,
    )(embeddings)
    return norms[0, :B]


class BaseMetricLossFunctionPallas:
    """JAX/Pallas equivalent of BaseMetricLossFunction (base class forward)."""

    def __init__(self, normalize_embeddings=True, num_class_per_param=None,
                 learnable_param_names=None):
        self.normalize_embeddings = normalize_embeddings
        self.num_class_per_param = num_class_per_param
        self.learnable_param_names = learnable_param_names
        # initialize_learnable_parameters: deterministic ones-init per
        # create_learnable_parameter (base class has no hyperparam attrs by
        # default, so init_value defaults to 1).
        self.params = {}
        if learnable_param_names is not None:
            vec_len = num_class_per_param if num_class_per_param else 1
            for k in learnable_param_names:
                self.params[k] = jnp.ones((vec_len,), jnp.float32)
        self.avg_embedding_norm = None
        self.embedding_norms = None

    def forward(self, embeddings, labels, indices_tuple=None):
        assert embeddings.shape[0] == labels.shape[0], (
            "Number of embeddings must equal number of labels")

        norms = _row_norms_pallas(embeddings, self.normalize_embeddings)
        self.embedding_norms = norms
        self.avg_embedding_norm = jnp.mean(norms)

        # compute_loss is abstract -> zero-loss fallback: sum(embeddings * 0) == 0.
        # The normalized embeddings themselves are not observable outside the
        # forward pass, so they are never materialized to HBM.
        return jnp.zeros((), embeddings.dtype)


if __name__ == "__main__":
    key = jax.random.PRNGKey(0)
    k_emb, k_lab, k2, k3, k4 = jax.random.split(key, 5)

    def ref_norms(x, normalize):
        x = x.astype(jnp.float32)
        n = jnp.linalg.norm(x, axis=1)
        if normalize:
            n = n / jnp.maximum(n, 1e-12)
        return n

    # ---- module-level test (small single-block path), normalize=True ----
    batch, hidden = 8, 32
    embeddings = jax.random.normal(k_emb, (batch, hidden), dtype=jnp.float32)
    labels = jax.random.randint(k_lab, (batch,), 0, 4, dtype=jnp.int32)

    loss_fn = BaseMetricLossFunctionPallas(normalize_embeddings=True)
    loss = loss_fn.forward(embeddings, labels)
    jax.block_until_ready(loss)
    jax.block_until_ready(loss_fn.embedding_norms)
    jax.block_until_ready(loss_fn.avg_embedding_norm)
    r = ref_norms(embeddings, True)
    assert jnp.allclose(loss_fn.embedding_norms, r, rtol=1e-5, atol=1e-4)
    assert jnp.allclose(loss_fn.avg_embedding_norm, jnp.mean(r), rtol=1e-5, atol=1e-4)
    assert float(loss) == 0.0

    # ---- normalize_embeddings=False path ----
    loss_fn_nf = BaseMetricLossFunctionPallas(normalize_embeddings=False)
    loss_nf = loss_fn_nf.forward(embeddings, labels)
    jax.block_until_ready(loss_nf)
    r_nf = ref_norms(embeddings, False)
    assert jnp.allclose(loss_fn_nf.embedding_norms, r_nf, rtol=1e-5, atol=1e-4)
    assert jnp.allclose(loss_fn_nf.avg_embedding_norm, jnp.mean(r_nf),
                        rtol=1e-5, atol=1e-4)
    assert float(loss_nf) == 0.0

    # ---- exercise the B-tiled path (partial last block, no input padding) ----
    xb = jax.random.normal(k2, (300, 256), dtype=jnp.float32)
    nb = _row_norms_pallas(xb, True, tile_budget_bytes=128 * 256 * 4, small_bytes=0)
    jax.block_until_ready(nb)
    assert nb.shape == (300,)
    assert jnp.allclose(nb, ref_norms(xb, True), rtol=1e-5, atol=1e-4)

    # ---- exercise the D-tiled path (single B tile + ragged-D column masking) ----
    xd = jax.random.normal(k3, (40, 200), dtype=jnp.float32)
    nd = _row_norms_pallas(xd, False, tile_budget_bytes=16 * 1024, small_bytes=0)
    jax.block_until_ready(nd)
    assert jnp.allclose(nd, ref_norms(xd, False), rtol=1e-5, atol=1e-4)

    # ---- exercise the D-tiled path (multiple B tiles, partial last B block) ----
    xd2 = jax.random.normal(k4, (700, 200), dtype=jnp.float32)
    nd2 = _row_norms_pallas(xd2, True, tile_budget_bytes=16 * 1024, small_bytes=0)
    jax.block_until_ready(nd2)
    assert jnp.allclose(nd2, ref_norms(xd2, True), rtol=1e-5, atol=1e-4)

    print("KERNEL_OK")
</pallas_src>

<mosaic_0001>
module attributes {stable_mosaic.version = 11 : i64} {
  func.func @kernel(%arg0: i32, %arg1: memref<8x32xf32, #tpu.memory_space<vmem>>, %arg2: memref<1x8xf32, #tpu.memory_space<vmem>>) attributes {dimension_semantics = [#tpu.dimension_semantics<arbitrary>], iteration_bounds = array<i64: 1>, scalar_prefetch = 0 : i64, scratch_operands = 0 : i64, tpu.core_type = #tpu.core_type<tc>, window_params = [{pipeline_mode = #tpu.pipeline_mode<synchronous>, transform_indices = @transform_0, window_bounds = array<i64: 8, 32>}, {pipeline_mode = #tpu.pipeline_mode<synchronous>, transform_indices = @transform_1, window_bounds = array<i64: 1, 8>}]} {
    %c0 = arith.constant 0 : index
    %c0_0 = arith.constant 0 : index
    %0 = vector.load %arg1[%c0, %c0_0] : memref<8x32xf32, #tpu.memory_space<vmem>>, vector<8x32xf32>
    %1 = arith.mulf %0, %0 : vector<8x32xf32>
    %cst = arith.constant dense<0.000000e+00> : vector<8xf32>
    %2 = vector.multi_reduction <add>, %1, %cst [1] : vector<8x32xf32> to vector<8xf32>
    %3 = math.sqrt %2 : vector<8xf32>
    %cst_1 = arith.constant 9.99999996E-13 : f32
    %4 = vector.broadcast %cst_1 : f32 to vector<8xf32>
    %5 = arith.maximumf %3, %4 : vector<8xf32>
    %6 = arith.divf %3, %5 : vector<8xf32>
    %7 = vector.shape_cast %6 : vector<8xf32> to vector<1x8xf32>
    %c0_2 = arith.constant 0 : index
    %c0_3 = arith.constant 0 : index
    %8 = vector.load %arg2[%c0_2, %c0_3] : memref<1x8xf32, #tpu.memory_space<vmem>>, vector<1x8xf32>
    tpu.vector_store %arg2[%c0_2, %c0_3], %7 {strides = array<i32>} : memref<1x8xf32, #tpu.memory_space<vmem>>, vector<1x8xf32>,
    return
  }
  func.func @transform_0(%arg0: i32) -> (i32, i32) {
    %c0_i32 = arith.constant 0 : i32
    %c0_i32_0 = arith.constant 0 : i32
    %c0_i32_1 = arith.constant 0 : i32
    return %c0_i32, %c0_i32_0 : i32, i32
  }
  func.func @transform_1(%arg0: i32) -> (i32, i32) {
    %c0_i32 = arith.constant 0 : i32
    %c0_i32_0 = arith.constant 0 : i32
    %c0_i32_1 = arith.constant 0 : i32
    return %c0_i32, %c0_i32_0 : i32, i32
  }
}

</mosaic_0001>

<bundles_post_ra>
// kernel: tpu_custom_call.1
= control target key start
LH: loop header
LB: loop body
LE: loop exit
PB: predicated region body
PF: predicated region fallthrough
CT: control target
= control target key end

     0   :  { %6 = vsyncpa [#allocation3], 0  ;;  %s152_s0 = inlined_call_operand.hbm [shape: f32[8,32], index: 0, kind: input, shape index: {}]   ;;  %s153_s1 = inlined_call_operand.hbm [shape: f32[1,8], index: 1, kind: output, shape index: {}]  }
   0x1   :  { %7 = vsyncpa [#allocation4], 0  ;;  %s116_s6 = smov [#allocation2]   ;;  %s68_s10 = scalar_lea.hbm %s152_s0, 128 }
   0x2   :  { %s14_s7 = sshll.u32 %s116_s6, 4  ;;  %p69_p0 = scmp.ne.s32.totalorder %s152_s0, %s68_s10  ;;  %s15_s7 = int_to_ptr.vmem [resolvable:$true] %s14_s7 }
   0x3   :  { %p72_p1 = scmp.lt.u32.totalorder %s68_s10, %s152_s0 }
   0x5   :  { %p74_p2 = pnand %p72_p1, %p69_p0 }
   0x7   :  { %77 = shalt.err (!%p74_p2)
}
   0x8   :  { %s78_s15 = scalar_lea.vmem %s15_s7, 128  ;;  %p83_p4 = scmp.lt.s32.totalorder %s15_s7, %s15_s7 }
   0x9   :  { %p79_p3 = scmp.ne.s32.totalorder %s15_s7, %s78_s15  ;;  %p84_p5 = scmp.lt.s32.totalorder %s78_s15, %s78_s15 }
   0xb   :  { %p85_p6 = por %p84_p5, %p83_p4 }
   0xd   :  { %p86_p7 = pnand %p85_p6, %p79_p3 }
   0xf   :  { %89 = shalt.err (!%p86_p7)
}
  0x10   :  { %17 = dma.hbm_to_vmem [thread:$0]  %s152_s0, 128, %s15_s7, [#allocation3]  }
  0x11   :  { %112 = dma.done.wait [#allocation3], 128  }
  0x12   :  { %113 = vsyncadd [#allocation3], 4294967168  ;;  %v21_v0 = vld [vmem:[#allocation2] sm:$0xff]  ;;  %vm23_vm0 = vcmask 261120   ;;  %v38_v10 = vlaneseq  ;;  %s117_s0 = smov [#allocation5]   ;;  %vm45_vm3 = vcmask 57344  }
  0x13   :  { %v22_v1 = vmul.f32 %v21_v0, %v21_v0  ;;  %s53_s18 = sshll.u32 %s117_s0, 4  ;;  %s54_s18 = int_to_ptr.vmem [resolvable:$true] %s53_s18 }
  0x14   :  { %v39_v11 = vand.u32 127, %v38_v10  ;;  %v41_v12 = vshrl.u32 %v38_v10, 7  ;;  %s90_s19 = scalar_lea.vmem %s54_s18, 16  ;;  %s94_s20 = scalar_lea.vmem %s54_s18, 32 }
  0x15   :  { %v24_v2 = vsel %vm23_vm0, %v22_v1, 0.0  ;;  %p91_p8 = scmp.ne.s32.totalorder %s54_s18, %s90_s19  ;;  %p95_p9 = scmp.lt.s32.totalorder %s54_s18, %s54_s18 }
  0x16   :  { %25 = vadd.xlane.f32.xlu0 %v24_v2  ;;  %v42_v13 = vsub.s32 %v39_v11, %v41_v12  ;;  %p96_p10 = scmp.lt.s32.totalorder %s94_s20, %s90_s19 }
  0x18   :  { %p97_p11 = por %p96_p10, %p95_p9 }
  0x1a   :  { %p98_p12 = pnand %p97_p11, %p91_p8 }
  0xa3   :  { %v26_v3 = vpop.xlane.xlu0 %25 }
  0xa4   :  { %64 = vrsqrt.f32 %v26_v3  ;;  %vm29_vm1 = vcmp.eq.f32.partialorder %v26_v3, inf  ;;  %v32_v6 = vand.u32 2147483648, %v26_v3  ;;  %vm31_vm2 = vcmp.eq.f32.partialorder %v26_v3, 0.0 }
  0xae   :  { %v65_v4 = vpop.eup %64 }
  0xaf   :  { %v28_v5 = vmul.f32 %v65_v4, %v26_v3 }
  0xb1   :  { %v30_v7 = vsel %vm29_vm1, %v26_v3, %v28_v5 }
  0xb2   :  { %v33_v8 = vsel %vm31_vm2, %v32_v6, %v30_v7 }
  0xb3   :  { %v34_v9 = vmax.f32 %v33_v8, 1e-12 }
  0xb5   :  { %66 = vrcp.f32 %v34_v9 }
  0xbf   :  { %v67_v14 = vpop.eup %66 }
  0xc0   :  { %v36_v15 = vmul.f32 %v67_v14, %v33_v8 }
  0xc2   :  { %v43_v16 = vrot.slane %v36_v15, %v42_v13 }
  0xc4   :  { %46 = vst.msk [vmem:[#allocation5] sm:$0x1] %vm45_vm3, %v43_v16 }
  0xc5   :  { %101 = shalt.err (!%p98_p12)
}
  0xc6   :  { %s102_s23 = scalar_lea.hbm %s153_s1, 16 }
  0xc7   :  { %p103_p13 = scmp.ne.s32.totalorder %s153_s1, %s102_s23  ;;  %p106_p0 = scmp.lt.u32.totalorder %s102_s23, %s153_s1 }
  0xc9   :  { %p108_p1 = pnand %p106_p0, %p103_p13 }
  0xcb   :  { %111 = shalt.err (!%p108_p1)
}
  0xcc   :  { %56 = dma.vmem_to_hbm [thread:$0]  %s54_s18, 16, %s153_s1, [#allocation4]  }
  0xcd   :  { %114 = dma.done.wait [#allocation4], 16  }
  0xce   :  { %115 = vsyncadd [#allocation4], 4294967280 }
  0xcf   :  { %60 = vsyncpa [#allocation3], 1 }
  0xd0   :  { %61 = vsyncpa [#allocation4], 1 }

</bundles_post_ra>
